<compile_context>
chip_gen: v7x
topology: tpu7x:2x2x1
jax: 0.10.0
libtpu: 0.0.40
codegen_flags: <defaults>
</compile_context>

<pallas_src>
import math

import jax
import jax.numpy as jnp
from jax import lax
from jax.experimental import pallas as pl
from jax.experimental.pallas import tpu as pltpu


_VMEM_BUDGET = 32 << 20   # bytes of accounted double-buffered kernel buffers
_VMEM_LIMIT = 48 << 20    # explicit scoped-VMEM limit (<= v7x 64 MiB physical)


def _round_up(n, m):
    return (n + m - 1) // m * m


def _cdiv(a, b):
    return -(-a // b)


def _make_logreg_kernel(d_valid, tk, ragged_k):
    """Kernel over grid (batch_tiles, k_tiles); k is the innermost reduction axis."""

    def kernel(x_ref, w_ref, b_ref, o_ref, acc_ref):
        # x_ref:   (tb, tk) activation tile (native dtype, streamed from HBM)
        # w_ref:   (1, tk)  lane-dense weight slice (resident when num_k == 1)
        # b_ref:   (1, 1)   f32 bias scalar in SMEM
        # o_ref:   (1, tb)  lane-dense output row for this batch tile
        # acc_ref: (1, tb)  f32 accumulator (VMEM scratch)
        k = pl.program_id(1)

        @pl.when(k == 0)
        def _init():
            acc_ref[...] = jnp.zeros_like(acc_ref)

        x = x_ref[...]
        if ragged_k:
            # Last K block overhangs D: zero the invalid columns (the matching
            # weight columns are zero-padded in the wrapper, so 0 * 0 = 0).
            col = k * tk + lax.broadcasted_iota(jnp.int32, x.shape, 1)
            x = jnp.where(col < d_valid, x, jnp.zeros_like(x))

        # Contract over the feature axis: (1, tk) . (tb, tk)^T -> (1, tb).
        # The result is already a lane-dense row; accumulation is f32 on MXU.
        acc_ref[...] += lax.dot_general(
            w_ref[...], x,
            dimension_numbers=(((1,), (1,)), ((), ())),
            preferred_element_type=jnp.float32,
        )

        @pl.when(k == pl.num_programs(1) - 1)
        def _finalize():
            z = acc_ref[...] + b_ref[0, 0]
            o_ref[...] = jax.nn.sigmoid(z).astype(o_ref.dtype)

    return kernel


def _derive_tiles(B, D, itemsize, budget):
    """Pick (tb, tk) so the double-buffered VMEM footprint fits `budget`."""
    acc_isz = 4  # f32 accumulator
    # Per batch row: x double-buffer + (1,tb)->(8,tb)-padded out double-buffer
    # + one f32 accumulator row.
    row_cost = 2 * D * itemsize + 2 * 8 * itemsize + 8 * acc_isz
    # Weight block (1, D) is sublane-padded to 8 rows and double-buffered.
    w_cost = 2 * 8 * D * itemsize

    if budget - w_cost >= 128 * row_cost:
        # Full-D blocks; tile only the batch axis.
        tk = D
        tb = (budget - w_cost) // row_cost // 128 * 128
    else:
        # Very large D: split the feature (reduction) axis.  A (128, tk) block
        # is still multi-MiB, so per-step overhead stays amortized.
        tb = 128
        col_cost = 2 * tb * itemsize + 2 * 8 * itemsize       # x + w per column
        fixed = 2 * 8 * tb * itemsize + 8 * tb * acc_isz      # out + accumulator
        tk = max((budget - fixed) // col_cost // 128 * 128, 128)

    # Don't make the batch tile larger than the (padded) batch itself.
    if B <= tb:
        if B >= 256:
            # Two tiles so the "parallel" batch axis can feed both v7x cores.
            tb = _round_up(_cdiv(B, 2), 128)
        else:
            tb = _round_up(B, 8)
    return tb, tk


def logistic_regression_forward(x, weight, bias, *, vmem_budget_bytes=_VMEM_BUDGET):
    """sigmoid(x @ weight.T + bias).  x: (B, D), weight: (1, D), bias: (1,) -> (B, 1)."""
    B, D = x.shape
    itemsize = jnp.dtype(x.dtype).itemsize

    tb, tk = _derive_tiles(B, D, itemsize, vmem_budget_bytes)
    num_tiles = _cdiv(B, tb)
    num_k = _cdiv(D, tk)
    b_pad = num_tiles * tb            # output-only padding (cheap); x is NOT padded
    d_pad = num_k * tk
    ragged_k = d_pad != D

    # Deliberate precision choice: run the matmul in x's dtype (bf16 x => bf16
    # weights on the MXU) with f32 accumulation, matching standard TPU practice.
    w_in = weight.astype(x.dtype)
    if ragged_k:
        # (1, D) weight is tiny -> zero-padding it is essentially free.
        w_in = jnp.pad(w_in, ((0, 0), (0, d_pad - D)))
    b_in = bias.reshape(1, 1).astype(jnp.float32)      # scalar -> SMEM

    kernel = _make_logreg_kernel(D, tk, ragged_k)

    cost = pl.CostEstimate(
        flops=2 * B * D,
        transcendentals=B,
        bytes_accessed=B * D * itemsize + D * itemsize + b_pad * itemsize,
    )

    out_row = pl.pallas_call(
        kernel,
        out_shape=jax.ShapeDtypeStruct((1, b_pad), x.dtype),
        grid=(num_tiles, num_k),
        in_specs=[
            pl.BlockSpec((tb, tk), lambda i, k: (i, k)),          # stream x tiles
            pl.BlockSpec((1, tk), lambda i, k: (0, k)),           # weight slice
            pl.BlockSpec(memory_space=pltpu.MemorySpace.SMEM),    # bias scalar
        ],
        out_specs=pl.BlockSpec((1, tb), lambda i, k: (0, i)),     # lane-dense row
        scratch_shapes=[pltpu.VMEM((1, tb), jnp.float32)],        # f32 accumulator
        compiler_params=pltpu.CompilerParams(
            dimension_semantics=("parallel", "arbitrary"),        # v7x megacore
            vmem_limit_bytes=_VMEM_LIMIT,
        ),
        cost_estimate=cost,
    )(x, w_in, b_in)

    return out_row[0, :B].reshape(B, 1)


if __name__ == "__main__":
    # Small demo shapes consistent with the module.
    batch = 8
    input_size = 32

    key = jax.random.PRNGKey(0)
    kx, kw, kb = jax.random.split(key, 3)

    # nn.Linear-style U(-1/sqrt(D), 1/sqrt(D)) init.
    bound = 1.0 / math.sqrt(input_size)
    weight = jax.random.uniform(kw, (1, input_size), jnp.float32, -bound, bound)
    bias = jax.random.uniform(kb, (1,), jnp.float32, -bound, bound)
    x = jax.random.normal(kx, (batch, input_size), jnp.float32)

    out = jax.block_until_ready(logistic_regression_forward(x, weight, bias))
    ref = jax.nn.sigmoid(x @ weight.T + bias)
    assert out.shape == (batch, 1)
    assert jnp.allclose(out, ref, atol=1e-4, rtol=1e-4)

    # Multi-tile grid + ragged batch tail (no wrapper-side padding of x).
    B2, D2 = 1037, 64
    k2x, k2w, k2b = jax.random.split(jax.random.PRNGKey(1), 3)
    bound2 = 1.0 / math.sqrt(D2)
    w2 = jax.random.uniform(k2w, (1, D2), jnp.float32, -bound2, bound2)
    b2 = jax.random.uniform(k2b, (1,), jnp.float32, -bound2, bound2)
    x2 = jax.random.normal(k2x, (B2, D2), jnp.float32)
    out2 = jax.block_until_ready(logistic_regression_forward(x2, w2, b2))
    ref2 = jax.nn.sigmoid(x2 @ w2.T + b2)
    assert out2.shape == (B2, 1)
    assert jnp.allclose(out2, ref2, atol=1e-4, rtol=1e-4)

    # K-reduction path with ragged D (forced via a tiny budget so D is split).
    B3, D3 = 300, 384
    k3x, k3w, k3b = jax.random.split(jax.random.PRNGKey(2), 3)
    bound3 = 1.0 / math.sqrt(D3)
    w3 = jax.random.uniform(k3w, (1, D3), jnp.float32, -bound3, bound3)
    b3 = jax.random.uniform(k3b, (1,), jnp.float32, -bound3, bound3)
    x3 = jax.random.normal(k3x, (B3, D3), jnp.float32)
    out3 = jax.block_until_ready(
        logistic_regression_forward(x3, w3, b3, vmem_budget_bytes=300 * 1024))
    ref3 = jax.nn.sigmoid(x3 @ w3.T + b3)
    assert out3.shape == (B3, 1)
    assert jnp.allclose(out3, ref3, atol=1e-4, rtol=1e-4)

    print("KERNEL_OK")
</pallas_src>

<mosaic_0001>
module attributes {stable_mosaic.version = 11 : i64} {
  func.func @kernel(%arg0: i32, %arg1: i32, %arg2: memref<8x32xf32, #tpu.memory_space<vmem>>, %arg3: memref<1x32xf32, #tpu.memory_space<vmem>>, %arg4: memref<1x1xf32, #tpu.memory_space<smem>>, %arg5: memref<1x8xf32, #tpu.memory_space<vmem>>, %arg6: memref<1x8xf32, #tpu.memory_space<vmem>>) attributes {dimension_semantics = [#tpu.dimension_semantics<parallel>, #tpu.dimension_semantics<arbitrary>], iteration_bounds = array<i64: 1, 1>, scalar_prefetch = 0 : i64, scratch_operands = 1 : i64, tpu.core_type = #tpu.core_type<tc>, window_params = [{transform_indices = @transform_0, window_bounds = array<i64: 8, 32>}, {transform_indices = @transform_1, window_bounds = array<i64: 1, 32>}, {transform_indices = @transform_2, window_bounds = array<i64: 1, 1>}, {transform_indices = @transform_3, window_bounds = array<i64: 1, 8>}]} {
    %c0_i32 = arith.constant 0 : i32
    %0 = arith.cmpi eq, %arg1, %c0_i32 : i32
    %1 = arith.extui %0 : i1 to i32
    %c0_i32_0 = arith.constant 0 : i32
    %2 = arith.cmpi ne, %1, %c0_i32_0 : i32
    scf.if %2 {
      %cst_10 = arith.constant 0.000000e+00 : f32
      %12 = vector.broadcast %cst_10 : f32 to vector<1x8xf32>
      %c0_11 = arith.constant 0 : index
      %c0_12 = arith.constant 0 : index
      %13 = vector.load %arg6[%c0_11, %c0_12] : memref<1x8xf32, #tpu.memory_space<vmem>>, vector<1x8xf32>
      tpu.vector_store %arg6[%c0_11, %c0_12], %12 {strides = array<i32>} : memref<1x8xf32, #tpu.memory_space<vmem>>, vector<1x8xf32>,
    } else {
    }
    %c0 = arith.constant 0 : index
    %c0_1 = arith.constant 0 : index
    %3 = vector.load %arg2[%c0, %c0_1] : memref<8x32xf32, #tpu.memory_space<vmem>>, vector<8x32xf32>
    %c0_2 = arith.constant 0 : index
    %c0_3 = arith.constant 0 : index
    %4 = vector.load %arg6[%c0_2, %c0_3] : memref<1x8xf32, #tpu.memory_space<vmem>>, vector<1x8xf32>
    %c0_4 = arith.constant 0 : index
    %c0_5 = arith.constant 0 : index
    %5 = vector.load %arg3[%c0_4, %c0_5] : memref<1x32xf32, #tpu.memory_space<vmem>>, vector<1x32xf32>
    %cst = arith.constant dense<0.000000e+00> : vector<1x8xf32>
    %6 = tpu.matmul %5, %3, %cst {dimension_numbers = #tpu.dot_dimension_numbers<[1], [1], [0], [0], [0, 0, 1, 0], [], []>} : vector<1x32xf32>, vector<8x32xf32>, vector<1x8xf32> -> vector<1x8xf32>
    %7 = arith.addf %4, %6 : vector<1x8xf32>
    %c0_6 = arith.constant 0 : index
    %c0_7 = arith.constant 0 : index
    %8 = vector.load %arg6[%c0_6, %c0_7] : memref<1x8xf32, #tpu.memory_space<vmem>>, vector<1x8xf32>
    tpu.vector_store %arg6[%c0_6, %c0_7], %7 {strides = array<i32>} : memref<1x8xf32, #tpu.memory_space<vmem>>, vector<1x8xf32>,
    %c0_i32_8 = arith.constant 0 : i32
    %9 = arith.cmpi eq, %arg1, %c0_i32_8 : i32
    %10 = arith.extui %9 : i1 to i32
    %c0_i32_9 = arith.constant 0 : i32
    %11 = arith.cmpi ne, %10, %c0_i32_9 : i32
    scf.if %11 {
      %c0_10 = arith.constant 0 : index
      %c0_11 = arith.constant 0 : index
      %12 = vector.load %arg6[%c0_10, %c0_11] : memref<1x8xf32, #tpu.memory_space<vmem>>, vector<1x8xf32>
      %c0_12 = arith.constant 0 : index
      %c0_13 = arith.constant 0 : index
      %13 = memref.load %arg4[%c0_12, %c0_13] : memref<1x1xf32, #tpu.memory_space<smem>>
      %14 = vector.broadcast %13 : f32 to vector<1x8xf32>
      %15 = arith.addf %12, %14 : vector<1x8xf32>
      %16 = arith.negf %15 : vector<1x8xf32>
      %17 = math.exp %16 : vector<1x8xf32>
      %cst_14 = arith.constant 1.000000e+00 : f32
      %18 = vector.broadcast %cst_14 : f32 to vector<1x8xf32>
      %19 = arith.addf %18, %17 : vector<1x8xf32>
      %20 = arith.divf %18, %19 : vector<1x8xf32>
      %c0_15 = arith.constant 0 : index
      %c0_16 = arith.constant 0 : index
      %21 = vector.load %arg5[%c0_15, %c0_16] : memref<1x8xf32, #tpu.memory_space<vmem>>, vector<1x8xf32>
      tpu.vector_store %arg5[%c0_15, %c0_16], %20 {strides = array<i32>} : memref<1x8xf32, #tpu.memory_space<vmem>>, vector<1x8xf32>,
    } else {
    }
    return
  }
  func.func @transform_0(%arg0: i32, %arg1: i32) -> (i32, i32) {
    %c0_i32 = arith.constant 0 : i32
    return %arg0, %arg1 : i32, i32
  }
  func.func @transform_1(%arg0: i32, %arg1: i32) -> (i32, i32) {
    %c0_i32 = arith.constant 0 : i32
    %c0_i32_0 = arith.constant 0 : i32
    return %c0_i32, %arg1 : i32, i32
  }
  func.func @transform_2(%arg0: i32, %arg1: i32) -> (i32, i32) {
    %c0_i32 = arith.constant 0 : i32
    %c0_i32_0 = arith.constant 0 : i32
    %c0_i32_1 = arith.constant 0 : i32
    return %c0_i32, %c0_i32_0 : i32, i32
  }
  func.func @transform_3(%arg0: i32, %arg1: i32) -> (i32, i32) {
    %c0_i32 = arith.constant 0 : i32
    %c0_i32_0 = arith.constant 0 : i32
    return %c0_i32, %arg0 : i32, i32
  }
}

</mosaic_0001>

<bundles_post_ra>
// kernel: tpu_custom_call.1
= control target key start
LH: loop header
LB: loop body
LE: loop exit
PB: predicated region body
PF: predicated region fallthrough
CT: control target
= control target key end

     0   :  { %9 = vsyncpa [#allocation5], 0  ;;  %s269_s0 = inlined_call_operand.hbm [shape: f32[8,32], index: 0, kind: input, shape index: {}]   ;;  %s270_s1 = inlined_call_operand.vmem [shape: f32[1,32], index: 1, kind: input, shape index: {}]   ;;  %s271_s2 = inlined_call_operand.<no memory space> [shape: f32[1,1], index: 2, kind: input, shape index: {}]   ;;  %s272_s3 = inlined_call_operand.hbm [shape: f32[1,8], index: 3, kind: output, shape index: {}]  }
   0x1   :  { %10 = vsyncpa [#allocation6], 0  ;;  %s212_s12 = smov [#allocation4]   ;;  %s164_s16 = scalar_lea.hbm %s269_s0, 128 }
   0x2   :  { %s17_s13 = sshll.u32 %s212_s12, 4  ;;  %p165_p0 = scmp.ne.s32.totalorder %s269_s0, %s164_s16  ;;  %s18_s13 = int_to_ptr.vmem [resolvable:$true] %s17_s13 }
   0x3   :  { %p168_p1 = scmp.lt.u32.totalorder %s164_s16, %s269_s0 }
   0x5   :  { %p170_p2 = pnand %p168_p1, %p165_p0 }
   0x7   :  { %173 = shalt.err (!%p170_p2)
}
   0x8   :  { %s174_s21 = scalar_lea.vmem %s18_s13, 128  ;;  %p179_p4 = scmp.lt.s32.totalorder %s18_s13, %s18_s13 }
   0x9   :  { %p175_p3 = scmp.ne.s32.totalorder %s18_s13, %s174_s21  ;;  %p180_p5 = scmp.lt.s32.totalorder %s174_s21, %s174_s21 }
   0xb   :  { %p181_p6 = por %p180_p5, %p179_p4 }
   0xd   :  { %p182_p7 = pnand %p181_p6, %p175_p3 }
   0xf   :  { %185 = shalt.err (!%p182_p7)
}
  0x10   :  { %20 = dma.hbm_to_vmem [thread:$0]  %s269_s0, 128, %s18_s13, [#allocation5]  }
  0x11   :  { %208 = dma.done.wait [#allocation5], 128  }
  0x12   :  { %209 = vsyncadd [#allocation5], 4294967168  ;;  %vm32_vm0 = vcmask 57344   ;;  %v213_v0 = vmov 0.0   ;;  %vm214_vm1 = vmmov 0   ;;  %vm37_vm2 = vcmask 261120  }
  0x13   :  { %33 = vst.msk [vmem:[#allocation2] sm:$0x1] %vm32_vm0, %v213_v0  ;;  %151 = vmatprep.subr.mxu0 %v213_v0  ;;  %153 = vmatprep.mubr.msk.f32.mxu0 %vm214_vm1, %v213_v0  ;;  %v34_v1 = vld [vmem:[#allocation4] sm:$0xff]  ;;  %v36_v2 = vld [vmem:[%s270_s1] sm:$0x1]  ;;  %v122_v7 = vstv %s271_s2  ;;  %s215_s27 = smov [#allocation7]  }
  0x14   :  { %152 = vmatpush3.xpose.msk.msra.mxu0 %vm37_vm2, %v34_v1  ;;  %s137_s1 = sshll.u32 %s215_s27, 4  ;;  %s138_s1 = int_to_ptr.vmem [resolvable:$true] %s137_s1 }
  0x15   :  { %s186_s28 = scalar_lea.vmem %s138_s1, 16  ;;  %s190_s29 = scalar_lea.vmem %s138_s1, 32 }
  0x16   :  { %p187_p8 = scmp.ne.s32.totalorder %s138_s1, %s186_s28  ;;  %p191_p9 = scmp.lt.s32.totalorder %s138_s1, %s138_s1 }
  0x17   :  { %154 = vmatmul.mubr.msk.f32.vlgmr.msra.gmra.mrb[0].mxu0 %vm37_vm2, %v36_v2  ;;  %p192_p10 = scmp.lt.s32.totalorder %s190_s29, %s186_s28 }
  0x19   :  { %p193_p11 = por %p192_p10, %p191_p9 }
  0x1a   :  { %v35_v3 = vld [vmem:[#allocation2] sm:$0x1] }
  0x1b   :  { %p194_p12 = pnand %p193_p11, %p187_p8 }
  0xea   :  { %v110_v4 = vpop.f32.mrb[0].mxu0 }
  0xeb   :  { %v114_v5 = vadd.f32 %v110_v4, %v35_v3  ;;  %v155_v6 = vpop.f32.mrb[1].mxu0 }
  0xed   :  { %116 = vst.msk [vmem:[#allocation2] sm:$0x1] %vm32_vm0, %v114_v5 }
  0xf4   :  { %v120_v8 = vld [vmem:[#allocation2] sm:$0x1] }
  0xf5   :  { %v123_v9 = vadd.f32 %v122_v7, %v120_v8 }
  0xf7   :  { %v148_v10 = vmul.f32 -1.442695, %v123_v9 }
  0xf9   :  { %160 = vpow2.f32 %v148_v10 }
 0x103   :  { %v161_v11 = vpop.eup %160 }
 0x104   :  { %v127_v12 = vadd.f32 1.0, %v161_v11 }
 0x106   :  { %162 = vrcp.f32 %v127_v12 }
 0x110   :  { %v163_v13 = vpop.eup %162 }
 0x111   :  { %130 = vst.msk [vmem:[#allocation7] sm:$0x1] %vm32_vm0, %v163_v13 }
 0x112   :  { %197 = shalt.err (!%p194_p12)
}
 0x113   :  { %s198_s4 = scalar_lea.hbm %s272_s3, 16 }
 0x114   :  { %p199_p13 = scmp.ne.s32.totalorder %s272_s3, %s198_s4  ;;  %p202_p0 = scmp.lt.u32.totalorder %s198_s4, %s272_s3 }
 0x116   :  { %p204_p1 = pnand %p202_p0, %p199_p13 }
 0x118   :  { %207 = shalt.err (!%p204_p1)
}
 0x119   :  { %140 = dma.vmem_to_hbm [thread:$0]  %s138_s1, 16, %s272_s3, [#allocation6]  }
 0x11a   :  { %210 = dma.done.wait [#allocation6], 16  }
 0x11b   :  { %211 = vsyncadd [#allocation6], 4294967280 }
 0x11c   :  { %144 = vsyncpa [#allocation5], 1 }
 0x11d   :  { %145 = vsyncpa [#allocation6], 1 }

</bundles_post_ra>
